<compile_context>
chip_gen: v7x
topology: tpu7x:2x2x1
jax: 0.10.0
libtpu: 0.0.40
codegen_flags: <defaults>
</compile_context>

<pallas_src>
import jax
import jax.numpy as jnp
import numpy as np
from jax.experimental import pallas as pl
from jax.experimental.pallas import tpu as pltpu


# ----------------------------------------------------------------------------- kernels
def _gather_min(logits_a, logits_b, action_ref, out_ref):
    """min of twin logits, then torch.gather(., 1, action) as one-hot + sublane sum."""
    a_dim, tb = logits_a.shape
    q_min = jnp.minimum(logits_a, logits_b)                               # (A, TB)
    act = action_ref[...]                                                 # (1, TB) i32
    row = jax.lax.broadcasted_iota(jnp.int32, (a_dim, tb), 0)
    out_ref[...] = jnp.sum(jnp.where(row == act, q_min, 0.0),
                           axis=0, keepdims=True)                         # (1, TB)


def twinq_fused_kernel(state_ref, action_ref,
                       w1_ref, b1_ref, w2_ref, b2_ref, w3_ref, b3_ref,
                       out_ref):
    """Small-H path: W2/W3 are block-diagonal (one MXU pass per layer).

    Shapes: state (TB, S), action (1, TB), w1 (2H, S), w2 (2H, 2H), w3 (2A, 2H),
    biases (*, 1), out (1, TB). Everything f32.
    """
    a_dim = w3_ref.shape[0] // 2
    # h = W1^T @ state^T (+b): MXU consumes the state block transposed -> no
    # wrapper-side transpose / extra HBM round-trip.
    h = jax.lax.dot_general(w1_ref[...], state_ref[...],
                            dimension_numbers=(((1,), (1,)), ((), ())),
                            preferred_element_type=jnp.float32) + b1_ref[...]   # (2H, TB)
    h = jnp.maximum(h, 0.0)
    h = jnp.dot(w2_ref[...], h, preferred_element_type=jnp.float32) + b2_ref[...]
    h = jnp.maximum(h, 0.0)
    logits = jnp.dot(w3_ref[...], h, preferred_element_type=jnp.float32) + b3_ref[...]
    _gather_min(logits[:a_dim, :], logits[a_dim:, :], action_ref, out_ref)


def twinq_split_kernel(state_ref, action_ref,
                       w1_ref, b1_ref, w2s_ref, b2_ref, w3s_ref, b3_ref,
                       out_ref):
    """Large-H path: two half-size matmuls per layer (no zero-block waste).

    Shapes: w1 (2H, S), w2s (2, H, H), w3s (2, A, H), biases (2H,1)/(2H,1)/(2A,1).
    """
    h_dim = w2s_ref.shape[1]
    a_dim = w3s_ref.shape[1]
    h = jax.lax.dot_general(w1_ref[...], state_ref[...],
                            dimension_numbers=(((1,), (1,)), ((), ())),
                            preferred_element_type=jnp.float32) + b1_ref[...]   # (2H, TB)
    h = jnp.maximum(h, 0.0)
    ha = jnp.maximum(jnp.dot(w2s_ref[0], h[:h_dim, :],
                             preferred_element_type=jnp.float32) + b2_ref[:h_dim, :], 0.0)
    hb = jnp.maximum(jnp.dot(w2s_ref[1], h[h_dim:, :],
                             preferred_element_type=jnp.float32) + b2_ref[h_dim:, :], 0.0)
    la = jnp.dot(w3s_ref[0], ha, preferred_element_type=jnp.float32) + b3_ref[:a_dim, :]
    lb = jnp.dot(w3s_ref[1], hb, preferred_element_type=jnp.float32) + b3_ref[a_dim:, :]
    _gather_min(la, lb, action_ref, out_ref)


# ----------------------------------------------------------------------------- wrapper
def _block_diag(a, b):
    ra, ca = a.shape
    rb, cb = b.shape
    top = jnp.concatenate([a, jnp.zeros((ra, cb), a.dtype)], axis=1)
    bot = jnp.concatenate([jnp.zeros((rb, ca), b.dtype), b], axis=1)
    return jnp.concatenate([top, bot], axis=0)


def twinq_forward(state, action, params):
    """state: (B, S) f32, action: (B, 1) int -> (B,) f32 = min(Q1[a], Q2[a])."""
    (w1a, b1a, w2a, b2a, w3a, b3a,
     w1b, b1b, w2b, b2b, w3b, b3b) = params

    B, S = state.shape
    H = w1a.shape[1]
    A = w3a.shape[1]
    dtype = jnp.float32  # f32 matmuls: matches the PyTorch reference; no bf16 dot.

    # ---- wrapper-side twin fusion (XLA, done once; never in-kernel) ----
    w1 = jnp.concatenate([w1a, w1b], axis=1).T.astype(dtype)             # (2H, S)
    b1 = jnp.concatenate([b1a, b1b], axis=1).T.astype(jnp.float32)       # (2H, 1)
    b2 = jnp.concatenate([b2a, b2b], axis=1).T.astype(jnp.float32)       # (2H, 1)
    b3 = jnp.concatenate([b3a, b3b], axis=1).T.astype(jnp.float32)       # (2A, 1)

    fuse_w23 = H < 256                      # block-diag only pays off for tiny H
    if fuse_w23:
        kernel = twinq_fused_kernel
        w2 = _block_diag(w2a, w2b).T.astype(dtype)                       # (2H, 2H)
        w3 = _block_diag(w3a, w3b).T.astype(dtype)                       # (2A, 2H)
    else:
        kernel = twinq_split_kernel
        w2 = jnp.stack([w2a.T, w2b.T]).astype(dtype)                     # (2, H, H)
        w3 = jnp.stack([w3a.T, w3b.T]).astype(dtype)                     # (2, A, H)

    # ---- batch tiling: >=2 grid steps when B > 128 (v7x megacore), TB <= 2048 ----
    n128 = -(-B // 128)
    chunks = max(1, min(16, -(-n128 // 2)))
    TB = 128 * chunks
    n_tiles = -(-B // TB)
    B_pad = n_tiles * TB

    # Only jnp.pad (fusable) — no transpose, no fresh zero buffer + update-slice.
    state_p = jnp.pad(state.astype(dtype), ((0, B_pad - B), (0, 0)))     # (B_pad, S)
    action_p = jnp.pad(action.reshape(1, B).astype(jnp.int32),
                       ((0, 0), (0, B_pad - B)))                         # (1, B_pad)

    # ---- specs ----
    # Constant weights: single-buffer them when large (double-buffering a resident
    # block is pure VMEM waste); keep the default for the tiny-H case.
    single_buffer_weights = not fuse_w23

    def resident_spec(arr):
        ndim = arr.ndim
        if single_buffer_weights:
            return pl.BlockSpec(arr.shape, lambda i: (0,) * ndim,
                                pipeline_mode=pl.Buffered(1))
        return pl.BlockSpec(arr.shape, lambda i: (0,) * ndim)

    in_specs = [
        pl.BlockSpec((TB, S), lambda i: (i, 0)),        # state, batch on sublanes
        pl.BlockSpec((1, TB), lambda i: (0, i)),        # action, batch on lanes
        resident_spec(w1), resident_spec(b1),
        resident_spec(w2), resident_spec(b2),
        resident_spec(w3), resident_spec(b3),
    ]
    out_specs = pl.BlockSpec((1, TB), lambda i: (0, i))  # lane-dense output

    # ---- VMEM budget: resident weights (+buffering) + 2x streaming tiles + slack ----
    weight_arrays = (w1, b1, w2, b2, w3, b3)
    weight_bytes = sum(int(a.size) * a.dtype.itemsize for a in weight_arrays)
    weight_bufs = 1 if single_buffer_weights else 2
    stream_bytes = 2 * (TB * S * 4 + TB * 4 + TB * 4)
    interm_bytes = 2 * 4 * TB * (2 * H + 2 * A)
    vmem_limit = weight_bufs * weight_bytes + stream_bytes + interm_bytes + (4 << 20)
    vmem_limit = int(min(max(vmem_limit, 16 << 20), 100 << 20))

    # ---- cost hint so XLA doesn't over-serialize around the custom call ----
    if fuse_w23:
        flops = 2 * B_pad * (S * 2 * H + (2 * H) * (2 * H) + (2 * H) * (2 * A))
    else:
        flops = 2 * B_pad * (S * 2 * H + 2 * H * H + 2 * H * A)
    operands = (state_p, action_p, w1, b1, w2, b2, w3, b3)
    bytes_accessed = (sum(int(x.size) * x.dtype.itemsize for x in operands)
                      + B_pad * 4)
    cost = pl.CostEstimate(flops=flops, transcendentals=0,
                           bytes_accessed=bytes_accessed)

    out = pl.pallas_call(
        kernel,
        out_shape=jax.ShapeDtypeStruct((1, B_pad), jnp.float32),
        grid=(n_tiles,),
        in_specs=in_specs,
        out_specs=out_specs,
        compiler_params=pltpu.CompilerParams(
            dimension_semantics=("parallel",),
            vmem_limit_bytes=vmem_limit),
        cost_estimate=cost,
    )(*operands)

    # torch.gather(...).flatten() + min -> (B,); drop the lane padding.
    return out[0, :B]


# ----------------------------------------------------------------------------- reference / init
def twinq_reference(state, action, params):
    (w1a, b1a, w2a, b2a, w3a, b3a,
     w1b, b1b, w2b, b2b, w3b, b3b) = params

    def mlp(x, w1, b1, w2, b2, w3, b3):
        h = jnp.maximum(x @ w1 + b1, 0.0)
        h = jnp.maximum(h @ w2 + b2, 0.0)
        return h @ w3 + b3

    q1 = mlp(state, w1a, b1a, w2a, b2a, w3a, b3a)
    q2 = mlp(state, w1b, b1b, w2b, b2b, w3b, b3b)
    idx = action.astype(jnp.int32)
    g1 = jnp.take_along_axis(q1, idx, axis=1)[:, 0]
    g2 = jnp.take_along_axis(q2, idx, axis=1)[:, 0]
    return jnp.minimum(g1, g2)


def init_params(key, state_dim, hidden_dim, action_dim):
    """Deterministic synthetic init for both MLPs: [S->H, H->H, H->A] each."""
    dims = [state_dim, hidden_dim, hidden_dim, action_dim]
    params = []
    for _ in range(2):                       # q1 and q2
        for i in range(len(dims) - 1):
            key, kw, kb = jax.random.split(key, 3)
            scale = 1.0 / jnp.sqrt(jnp.float32(dims[i]))
            w = jax.random.uniform(kw, (dims[i], dims[i + 1]),
                                   jnp.float32, -scale, scale)
            b = jax.random.uniform(kb, (1, dims[i + 1]),
                                   jnp.float32, -scale, scale)
            params.extend([w, b])
    return params


if __name__ == "__main__":
    B, STATE_DIM, HIDDEN_DIM, ACTION_DIM = 8, 16, 32, 8

    key = jax.random.PRNGKey(0)
    k_state, k_action, k_params = jax.random.split(key, 3)

    state = jax.random.normal(k_state, (B, STATE_DIM), jnp.float32)
    action = jax.random.randint(k_action, (B, 1), 0, ACTION_DIM, jnp.int32)
    params = init_params(k_params, STATE_DIM, HIDDEN_DIM, ACTION_DIM)

    q_min = jax.jit(twinq_forward)(state, action, params)
    jax.block_until_ready(q_min)
    assert q_min.shape == (B,) and q_min.dtype == jnp.float32

    q_ref = twinq_reference(state, action, params)
    np.testing.assert_allclose(np.asarray(q_min), np.asarray(q_ref),
                               rtol=1e-3, atol=1e-3)
    print("KERNEL_OK")
</pallas_src>

<mosaic_0001>
module attributes {stable_mosaic.version = 11 : i64} {
  func.func @twinq_fused_kernel(%arg0: i32, %arg1: memref<128x16xf32, #tpu.memory_space<vmem>>, %arg2: memref<1x128xi32, #tpu.memory_space<vmem>>, %arg3: memref<64x16xf32, #tpu.memory_space<vmem>>, %arg4: memref<64x1xf32, #tpu.memory_space<vmem>>, %arg5: memref<64x64xf32, #tpu.memory_space<vmem>>, %arg6: memref<64x1xf32, #tpu.memory_space<vmem>>, %arg7: memref<16x64xf32, #tpu.memory_space<vmem>>, %arg8: memref<16x1xf32, #tpu.memory_space<vmem>>, %arg9: memref<1x128xf32, #tpu.memory_space<vmem>>) attributes {dimension_semantics = [#tpu.dimension_semantics<parallel>], iteration_bounds = array<i64: 1>, scalar_prefetch = 0 : i64, scratch_operands = 0 : i64, tpu.core_type = #tpu.core_type<tc>, window_params = [{transform_indices = @transform_0, window_bounds = array<i64: 128, 16>}, {transform_indices = @transform_1, window_bounds = array<i64: 1, 128>}, {pipeline_mode = #tpu.pipeline_mode<synchronous>, transform_indices = @transform_2, window_bounds = array<i64: 64, 16>}, {pipeline_mode = #tpu.pipeline_mode<synchronous>, transform_indices = @transform_3, window_bounds = array<i64: 64, 1>}, {pipeline_mode = #tpu.pipeline_mode<synchronous>, transform_indices = @transform_4, window_bounds = array<i64: 64, 64>}, {pipeline_mode = #tpu.pipeline_mode<synchronous>, transform_indices = @transform_5, window_bounds = array<i64: 64, 1>}, {pipeline_mode = #tpu.pipeline_mode<synchronous>, transform_indices = @transform_6, window_bounds = array<i64: 16, 64>}, {pipeline_mode = #tpu.pipeline_mode<synchronous>, transform_indices = @transform_7, window_bounds = array<i64: 16, 1>}, {transform_indices = @transform_8, window_bounds = array<i64: 1, 128>}]} {
    %c0 = arith.constant 0 : index
    %c0_0 = arith.constant 0 : index
    %0 = vector.load %arg3[%c0, %c0_0] : memref<64x16xf32, #tpu.memory_space<vmem>>, vector<64x16xf32>
    %c0_1 = arith.constant 0 : index
    %c0_2 = arith.constant 0 : index
    %1 = vector.load %arg1[%c0_1, %c0_2] : memref<128x16xf32, #tpu.memory_space<vmem>>, vector<128x16xf32>
    %cst = arith.constant dense<0.000000e+00> : vector<64x128xf32>
    %2 = tpu.matmul %0, %1, %cst {dimension_numbers = #tpu.dot_dimension_numbers<[1], [1], [0], [0], [0, 0, 1, 0], [], []>} : vector<64x16xf32>, vector<128x16xf32>, vector<64x128xf32> -> vector<64x128xf32>
    %c0_3 = arith.constant 0 : index
    %c0_4 = arith.constant 0 : index
    %3 = vector.load %arg4[%c0_3, %c0_4] : memref<64x1xf32, #tpu.memory_space<vmem>>, vector<64x1xf32>
    %4 = vector.broadcast %3 : vector<64x1xf32> to vector<64x128xf32>
    %5 = arith.addf %2, %4 : vector<64x128xf32>
    %cst_5 = arith.constant 0.000000e+00 : f32
    %6 = vector.broadcast %cst_5 : f32 to vector<64x128xf32>
    %7 = arith.maximumf %5, %6 : vector<64x128xf32>
    %c0_6 = arith.constant 0 : index
    %c0_7 = arith.constant 0 : index
    %8 = vector.load %arg5[%c0_6, %c0_7] : memref<64x64xf32, #tpu.memory_space<vmem>>, vector<64x64xf32>
    %cst_8 = arith.constant dense<0.000000e+00> : vector<64x128xf32>
    %9 = tpu.matmul %8, %7, %cst_8 {dimension_numbers = #tpu.dot_dimension_numbers<[1], [0], [0], [1], [0, 0, 1, 1], [], []>} : vector<64x64xf32>, vector<64x128xf32>, vector<64x128xf32> -> vector<64x128xf32>
    %c0_9 = arith.constant 0 : index
    %c0_10 = arith.constant 0 : index
    %10 = vector.load %arg6[%c0_9, %c0_10] : memref<64x1xf32, #tpu.memory_space<vmem>>, vector<64x1xf32>
    %11 = vector.broadcast %10 : vector<64x1xf32> to vector<64x128xf32>
    %12 = arith.addf %9, %11 : vector<64x128xf32>
    %cst_11 = arith.constant 0.000000e+00 : f32
    %13 = vector.broadcast %cst_11 : f32 to vector<64x128xf32>
    %14 = arith.maximumf %12, %13 : vector<64x128xf32>
    %c0_12 = arith.constant 0 : index
    %c0_13 = arith.constant 0 : index
    %15 = vector.load %arg7[%c0_12, %c0_13] : memref<16x64xf32, #tpu.memory_space<vmem>>, vector<16x64xf32>
    %cst_14 = arith.constant dense<0.000000e+00> : vector<16x128xf32>
    %16 = tpu.matmul %15, %14, %cst_14 {dimension_numbers = #tpu.dot_dimension_numbers<[1], [0], [0], [1], [0, 0, 1, 1], [], []>} : vector<16x64xf32>, vector<64x128xf32>, vector<16x128xf32> -> vector<16x128xf32>
    %c0_15 = arith.constant 0 : index
    %c0_16 = arith.constant 0 : index
    %17 = vector.load %arg8[%c0_15, %c0_16] : memref<16x1xf32, #tpu.memory_space<vmem>>, vector<16x1xf32>
    %18 = vector.broadcast %17 : vector<16x1xf32> to vector<16x128xf32>
    %19 = arith.addf %16, %18 : vector<16x128xf32>
    %20 = vector.extract_strided_slice %19 {offsets = [0, 0], sizes = [8, 128], strides = [1, 1]} : vector<16x128xf32> to vector<8x128xf32>
    %21 = vector.extract_strided_slice %19 {offsets = [8, 0], sizes = [8, 128], strides = [1, 1]} : vector<16x128xf32> to vector<8x128xf32>
    %22 = arith.minimumf %20, %21 : vector<8x128xf32>
    %c0_17 = arith.constant 0 : index
    %c0_18 = arith.constant 0 : index
    %23 = vector.load %arg2[%c0_17, %c0_18] : memref<1x128xi32, #tpu.memory_space<vmem>>, vector<1x128xi32>
    %24 = tpu.iota {dimensions = array<i32: 0>} : vector<8x128xi32>
    %25 = vector.broadcast %23 : vector<1x128xi32> to vector<8x128xi32>
    %26 = arith.cmpi eq, %24, %25 : vector<8x128xi32>
    %cst_19 = arith.constant 0.000000e+00 : f32
    %27 = vector.broadcast %cst_19 : f32 to vector<8x128xf32>
    %28 = arith.select %26, %22, %27 : vector<8x128xi1>, vector<8x128xf32>
    %cst_20 = arith.constant dense<0.000000e+00> : vector<128xf32>
    %29 = vector.multi_reduction <add>, %28, %cst_20 [0] : vector<8x128xf32> to vector<128xf32>
    %30 = vector.shape_cast %29 : vector<128xf32> to vector<1x128xf32>
    %c0_21 = arith.constant 0 : index
    %c0_22 = arith.constant 0 : index
    %31 = vector.load %arg9[%c0_21, %c0_22] : memref<1x128xf32, #tpu.memory_space<vmem>>, vector<1x128xf32>
    tpu.vector_store %arg9[%c0_21, %c0_22], %30 {strides = array<i32>} : memref<1x128xf32, #tpu.memory_space<vmem>>, vector<1x128xf32>,
    return
  }
  func.func @transform_0(%arg0: i32) -> (i32, i32) {
    %c0_i32 = arith.constant 0 : i32
    %c0_i32_0 = arith.constant 0 : i32
    return %arg0, %c0_i32 : i32, i32
  }
  func.func @transform_1(%arg0: i32) -> (i32, i32) {
    %c0_i32 = arith.constant 0 : i32
    %c0_i32_0 = arith.constant 0 : i32
    return %c0_i32, %arg0 : i32, i32
  }
  func.func @transform_2(%arg0: i32) -> (i32, i32) {
    %c0_i32 = arith.constant 0 : i32
    %c0_i32_0 = arith.constant 0 : i32
    %c0_i32_1 = arith.constant 0 : i32
    return %c0_i32, %c0_i32_0 : i32, i32
  }
  func.func @transform_3(%arg0: i32) -> (i32, i32) {
    %c0_i32 = arith.constant 0 : i32
    %c0_i32_0 = arith.constant 0 : i32
    %c0_i32_1 = arith.constant 0 : i32
    return %c0_i32, %c0_i32_0 : i32, i32
  }
  func.func @transform_4(%arg0: i32) -> (i32, i32) {
    %c0_i32 = arith.constant 0 : i32
    %c0_i32_0 = arith.constant 0 : i32
    %c0_i32_1 = arith.constant 0 : i32
    return %c0_i32, %c0_i32_0 : i32, i32
  }
  func.func @transform_5(%arg0: i32) -> (i32, i32) {
    %c0_i32 = arith.constant 0 : i32
    %c0_i32_0 = arith.constant 0 : i32
    %c0_i32_1 = arith.constant 0 : i32
    return %c0_i32, %c0_i32_0 : i32, i32
  }
  func.func @transform_6(%arg0: i32) -> (i32, i32) {
    %c0_i32 = arith.constant 0 : i32
    %c0_i32_0 = arith.constant 0 : i32
    %c0_i32_1 = arith.constant 0 : i32
    return %c0_i32, %c0_i32_0 : i32, i32
  }
  func.func @transform_7(%arg0: i32) -> (i32, i32) {
    %c0_i32 = arith.constant 0 : i32
    %c0_i32_0 = arith.constant 0 : i32
    %c0_i32_1 = arith.constant 0 : i32
    return %c0_i32, %c0_i32_0 : i32, i32
  }
  func.func @transform_8(%arg0: i32) -> (i32, i32) {
    %c0_i32 = arith.constant 0 : i32
    %c0_i32_0 = arith.constant 0 : i32
    return %c0_i32, %arg0 : i32, i32
  }
}

</mosaic_0001>

<bundles_post_ra>
// kernel: twinq_forward.1
= control target key start
LH: loop header
LB: loop body
LE: loop exit
PB: predicated region body
PF: predicated region fallthrough
CT: control target
= control target key end

     0   :  { %vm101_vm0 = vcmask 130048   ;;  %v856_v3 = vmov 0   ;;  %vm343_vm2 = vcmask 523264   ;;  %s1120_s0 = inlined_call_operand.vmem [shape: f32[128,16], index: 0, kind: input, shape index: {}]   ;;  %s1121_s2 = inlined_call_operand.vmem [shape: f32[64,16], index: 2, kind: input, shape index: {}]   ;;  %s1122_s3 = inlined_call_operand.vmem [shape: f32[64,1], index: 3, kind: input, shape index: {}]   ;;  %s1123_s5 = inlined_call_operand.vmem [shape: f32[64,1], index: 5, kind: input, shape index: {}]   ;;  %s1124_s7 = inlined_call_operand.vmem [shape: f32[16,1], index: 7, kind: input, shape index: {}]   ;;  %s1125_s4 = inlined_call_operand.vmem [shape: f32[64,64], index: 4, kind: input, shape index: {}]   ;;  %s1126_s6 = inlined_call_operand.vmem [shape: f32[16,64], index: 6, kind: input, shape index: {}]   ;;  %s1127_s1 = inlined_call_operand.vmem [shape: s32[1,128], index: 1, kind: input, shape index: {}]   ;;  %s1128_s8 = inlined_call_operand.vmem [shape: f32[1,128], index: 8, kind: output, shape index: {}]  }
   0x1   :  { %v37_v0 = vld [vmem:[%s1120_s0] sm:$0xff]  ;;  %v38_v1 = vld [vmem:[%s1120_s0 + $0x8] sm:$0xff]  ;;  %vm910_vm1 = vmpackc.low %vm101_vm0, %vm101_vm0  ;;  %854 = vset.pattern.permute.xlu0 %v856_v3  ;;  %855 = vset.pattern.permute.xlu1 %v856_v3 }
   0x2   :  { %v773_v4 = vpack.c.bf16 %v38_v1, %v37_v0  ;;  %v39_v5 = vld [vmem:[%s1120_s0 + $0x10] sm:$0xff]  ;;  %v40_v6 = vld [vmem:[%s1120_s0 + $0x18] sm:$0xff]  ;;  %v29_v8 = vld [vmem:[%s1121_s2] sm:$0xff] }
   0x3   :  { %v779_v7 = vpack.c.bf16 %v40_v6, %v39_v5  ;;  %v41_v9 = vld [vmem:[%s1120_s0 + $0x20] sm:$0xff]  ;;  %v42_v10 = vld [vmem:[%s1120_s0 + $0x28] sm:$0xff]  ;;  %714 = vmatprep.mubr.msk.f32.mxu0 %vm101_vm0, %v29_v8  ;;  %v55_v12 = vld [vmem:[%s1122_s3 + $0x10] sm:$0xff] }
   0x4   :  { %775 = vmatprep.subr.msk.bf16.mxu0 %vm910_vm1, %v773_v4  ;;  %v53_v11 = vld [vmem:[%s1122_s3] sm:$0xff]  ;;  %v785_v13 = vpack.c.bf16 %v42_v10, %v41_v9  ;;  %73 = vperm.xlu1 %855, %v55_v12   ;;  %v54_v14 = vld [vmem:[%s1122_s3 + $0x8] sm:$0xff]  ;;  %v56_v15 = vld [vmem:[%s1122_s3 + $0x18] sm:$0xff] }
   0x5   :  { %778 = vmatpush3.bf16.xpose.msk.msra.mxu0 %vm910_vm1, %v773_v4  ;;  %63 = vperm.xlu0 %854, %v53_v11   ;;  %v43_v16 = vld [vmem:[%s1120_s0 + $0x30] sm:$0xff]  ;;  %v44_v17 = vld [vmem:[%s1120_s0 + $0x38] sm:$0xff]  ;;  %v57_v18 = vld [vmem:[%s1122_s3 + $0x20] sm:$0xff] }
   0x6   :  { %781 = vmatprep.subr.msk.bf16.mxu0 %vm910_vm1, %v779_v7  ;;  %v58_v19 = vld [vmem:[%s1122_s3 + $0x28] sm:$0xff]  ;;  %v791_v20 = vpack.c.bf16 %v44_v17, %v43_v16  ;;  %v59_v21 = vld [vmem:[%s1122_s3 + $0x30] sm:$0xff]  ;;  %v60_v22 = vld [vmem:[%s1122_s3 + $0x38] sm:$0xff] }
   0x7   :  { %v45_v23 = vld [vmem:[%s1120_s0 + $0x40] sm:$0xff]  ;;  %v46_v24 = vld [vmem:[%s1120_s0 + $0x48] sm:$0xff]  ;;  %v297_v28 = vld [vmem:[%s1123_s5 + $0x10] sm:$0xff] }
   0x8   :  { %78 = vperm.xlu1 %855, %v56_v15   ;;  %v295_v25 = vld [vmem:[%s1123_s5] sm:$0xff]  ;;  %v296_v26 = vld [vmem:[%s1123_s5 + $0x8] sm:$0xff]  ;;  %v797_v27 = vpack.c.bf16 %v46_v24, %v45_v23  ;;  %v298_v29 = vld [vmem:[%s1123_s5 + $0x18] sm:$0xff] }
   0x9   :  { %68 = vperm.xlu0 %854, %v54_v14   ;;  %v47_v30 = vld [vmem:[%s1120_s0 + $0x50] sm:$0xff]  ;;  %v48_v31 = vld [vmem:[%s1120_s0 + $0x58] sm:$0xff]  ;;  %v299_v32 = vld [vmem:[%s1123_s5 + $0x20] sm:$0xff] }
   0xa   :  { %v300_v33 = vld [vmem:[%s1123_s5 + $0x28] sm:$0xff]  ;;  %v803_v34 = vpack.c.bf16 %v48_v31, %v47_v30  ;;  %v301_v35 = vld [vmem:[%s1123_s5 + $0x30] sm:$0xff]  ;;  %v302_v36 = vld [vmem:[%s1123_s5 + $0x38] sm:$0xff] }
   0xb   :  { %v49_v37 = vld [vmem:[%s1120_s0 + $0x60] sm:$0xff]  ;;  %v50_v38 = vld [vmem:[%s1120_s0 + $0x68] sm:$0xff]  ;;  %v51_v42 = vld [vmem:[%s1120_s0 + $0x70] sm:$0xff] }
   0xc   :  { %88 = vperm.xlu1 %855, %v58_v19   ;;  %v483_v39 = vld [vmem:[%s1124_s7] sm:$0xff]  ;;  %v484_v40 = vld [vmem:[%s1124_s7 + $0x8] sm:$0xff]  ;;  %v809_v41 = vpack.c.bf16 %v50_v38, %v49_v37  ;;  %v52_v43 = vld [vmem:[%s1120_s0 + $0x78] sm:$0xff] }
   0xd   :  { %784 = vmatpush3.bf16.xpose.msk.msra.mxu0 %vm910_vm1, %v779_v7  ;;  %83 = vperm.xlu0 %854, %v57_v18   ;;  %v815_v44 = vpack.c.bf16 %v52_v43, %v51_v42  ;;  %v30_v45 = vld [vmem:[%s1121_s2 + $0x8] sm:$0xff]  ;;  %v31_v46 = vld [vmem:[%s1121_s2 + $0x10] sm:$0xff]  ;;  %v32_v47 = vld [vmem:[%s1121_s2 + $0x18] sm:$0xff] }
   0xe   :  { %787 = vmatprep.subr.msk.bf16.mxu0 %vm910_vm1, %v785_v13  ;;  %v33_v48 = vld [vmem:[%s1121_s2 + $0x20] sm:$0xff]  ;;  %v34_v49 = vld [vmem:[%s1121_s2 + $0x28] sm:$0xff]  ;;  %v35_v50 = vld [vmem:[%s1121_s2 + $0x30] sm:$0xff] }
   0xf   :  { %v36_v51 = vld [vmem:[%s1121_s2 + $0x38] sm:$0xff]  ;;  %v287_v52 = vld [vmem:[%s1125_s4] sm:$0xff]  ;;  %v293_v30 = vld [vmem:[%s1125_s4 + $0x30] sm:$0xff] }
  0x10   :  { %98 = vperm.xlu1 %855, %v60_v22   ;;  %742 = vmatprep.mubr.msk.f32.mxu1 %vm343_vm2, %v287_v52  ;;  %v294_v31 = vld [vmem:[%s1125_s4 + $0x38] sm:$0xff] }
  0x11   :  { %93 = vperm.xlu0 %854, %v59_v21  }
  0x14   :  { %310 = vperm.xlu1 %855, %v296_v26   ;;  %v289_v26 = vld [vmem:[%s1125_s4 + $0x10] sm:$0xff] }
  0x15   :  { %790 = vmatpush3.bf16.xpose.msk.msra.mxu0 %vm910_vm1, %v785_v13  ;;  %305 = vperm.xlu0 %854, %v295_v25   ;;  %v288_v25 = vld [vmem:[%s1125_s4 + $0x8] sm:$0xff] }
  0x16   :  { %793 = vmatprep.subr.msk.bf16.mxu0 %vm910_vm1, %v791_v20 }
  0x18   :  { %320 = vperm.xlu1 %855, %v298_v29   ;;  %v292_v29 = vld [vmem:[%s1125_s4 + $0x28] sm:$0xff] }
  0x19   :  { %315 = vperm.xlu0 %854, %v297_v28   ;;  %v291_v28 = vld [vmem:[%s1125_s4 + $0x20] sm:$0xff] }
  0x1c   :  { %330 = vperm.xlu1 %855, %v300_v33  }
  0x1d   :  { %796 = vmatpush3.bf16.xpose.msk.msra.mxu0 %vm910_vm1, %v791_v20  ;;  %325 = vperm.xlu0 %854, %v299_v32   ;;  %v481_v32 = vld [vmem:[%s1126_s6] sm:$0xff] }
  0x1e   :  { %799 = vmatprep.subr.msk.bf16.mxu0 %vm910_vm1, %v797_v27 }
  0x20   :  { %340 = vperm.xlu1 %855, %v302_v36  }
  0x21   :  { %335 = vperm.xlu0 %854, %v301_v35  }
  0x24   :  { %492 = vperm.xlu1 %855, %v484_v40  }
  0x25   :  { %802 = vmatpush3.bf16.xpose.msk.msra.mxu0 %vm910_vm1, %v797_v27  ;;  %487 = vperm.xlu0 %854, %v483_v39   ;;  %v290_v27 = vld [vmem:[%s1125_s4 + $0x18] sm:$0xff] }
  0x26   :  { %805 = vmatprep.subr.msk.bf16.mxu0 %vm910_vm1, %v803_v34 }
  0x2d   :  { %808 = vmatpush3.bf16.xpose.msk.msra.mxu0 %vm910_vm1, %v803_v34 }
  0x2e   :  { %811 = vmatprep.subr.msk.bf16.mxu0 %vm910_vm1, %v809_v41 }
  0x35   :  { %814 = vmatpush3.bf16.xpose.msk.msra.mxu0 %vm910_vm1, %v809_v41 }
  0x36   :  { %817 = vmatprep.subr.msk.bf16.mxu0 %vm910_vm1, %v815_v44 }
  0x3d   :  { %820 = vmatpush3.bf16.xpose.msk.msra.mxu0 %vm910_vm1, %v815_v44 }
  0x44   :  { %715 = vmatmul.mubr.msk.f32.vlgmr.msra.gmra.mrb[0].mxu0 %vm101_vm0, %v30_v45 }
  0x45   :  { %717 = vmatprep.mubr.msk.f32.mxu0 %vm101_vm0, %v31_v46 }
  0x48   :  { %718 = vmatmul.mubr.msk.f32.gmra.mrb[2].mxu0 %vm101_vm0, %v32_v47 }
  0x49   :  { %720 = vmatprep.mubr.msk.f32.mxu0 %vm101_vm0, %v33_v48 }
  0x4c   :  { %721 = vmatmul.mubr.msk.f32.gmra.mrb[4].mxu0 %vm101_vm0, %v34_v49 }
  0x4d   :  { %723 = vmatprep.mubr.msk.f32.mxu0 %vm101_vm0, %v35_v50 }
  0x50   :  { %724 = vmatmul.mubr.msk.f32.gmra.mrb[6].mxu0 %vm101_vm0, %v36_v51 }
  0x83   :  { %v74_v54 = vpop.permute.xlu1 %73 }
  0x84   :  { %v64_v53 = vpop.permute.xlu0 %63 }
  0x87   :  { %v79_v56 = vpop.permute.xlu1 %78 }
  0x88   :  { %v69_v55 = vpop.permute.xlu0 %68 }
  0x8b   :  { %v89_v2 = vpop.permute.xlu1 %88 }
  0x8c   :  { %v84_v5 = vpop.permute.xlu0 %83 }
  0x8f   :  { %v99_v14 = vpop.permute.xlu1 %98 }
  0x90   :  { %v94_v17 = vpop.permute.xlu0 %93 }
  0x93   :  { %v311_v33 = vpop.permute.xlu1 %310 }
  0x94   :  { %v306_v34 = vpop.permute.xlu0 %305 }
  0x97   :  { %v321_v35 = vpop.permute.xlu1 %320 }
  0x98   :  { %v316_v37 = vpop.permute.xlu0 %315 }
  0x9b   :  { %v331_v46 = vpop.permute.xlu1 %330 }
  0x9c   :  { %v326_v49 = vpop.permute.xlu0 %325 }
 0x117   :  { %v716_v57 = vpop.f32.mrb[0].mxu0 }
 0x118   :  { %v246_v58 = vadd.f32 %v716_v57, %v69_v55  ;;  %v240_v59 = vpop.f32.mrb[1].mxu0 }
 0x119   :  { %v241_v60 = vadd.f32 %v240_v59, %v64_v53 }
 0x11a   :  { %v280_v61 = vmax.f32 %v246_v58, 0.0  ;;  %v341_v58 = vpop.permute.xlu1 %340 }
 0x11b   :  { %v279_v62 = vmax.f32 %v241_v60, 0.0  ;;  %v719_v63 = vpop.f32.mrb[2].mxu0 }
 0x11c   :  { %v256_v0 = vadd.f32 %v719_v63, %v79_v56  ;;  %v250_v1 = vpop.f32.mrb[3].mxu0 }
 0x11d   :  { %v251_v3 = vadd.f32 %v250_v1, %v74_v54  ;;  %v821_v4 = vpack.c.bf16 %v280_v61, %v279_v62  ;;  %v336_v61 = vpop.permute.xlu0 %335 }
 0x11e   :  { %v282_v6 = vmax.f32 %v256_v0, 0.0 }
 0x11f   :  { %v281_v7 = vmax.f32 %v251_v3, 0.0  ;;  %v722_v8 = vpop.f32.mrb[4].mxu0  ;;  %822 = vmatprep.subr.bf16.mxu1 %v821_v4 }
 0x120   :  { %v266_v9 = vadd.f32 %v722_v8, %v89_v2  ;;  %v260_v10 = vpop.f32.mrb[5].mxu0  ;;  %824 = vmatpush3.bf16.msra.mxu1 %v821_v4  ;;  %v493_v8 = vpop.permute.xlu1 %492 }
 0x121   :  { %v825_v11 = vpack.c.bf16 %v282_v6, %v281_v7  ;;  %v261_v12 = vadd.f32 %v260_v10, %v84_v5  ;;  %v482_v5 = vld [vmem:[%s1126_s6 + $0x8] sm:$0xff]  ;;  %v578_v6 = vlaneseq  ;;  %v631_v10 = vld [vmem:[%s1127_s1] ss:$0 sm:$0xff] }
 0x122   :  { %v284_v13 = vmax.f32 %v266_v9, 0.0 }
 0x123   :  { %v283_v15 = vmax.f32 %v261_v12, 0.0  ;;  %v725_v16 = vpop.f32.mrb[6].mxu0  ;;  %826 = vmatprep.subr.bf16.mxu1 %v825_v11  ;;  %v579_v7 = vshrl.u32 %v578_v6, 7 }
 0x124   :  { %v276_v18 = vadd.f32 %v725_v16, %v99_v14  ;;  %v270_v19 = vpop.f32.mrb[7].mxu0  ;;  %828 = vmatpush3.bf16.msra.mxu1 %v825_v11  ;;  %v488_v11 = vpop.permute.xlu0 %487 }
 0x125   :  { %v829_v20 = vpack.c.bf16 %v284_v13, %v283_v15  ;;  %v271_v21 = vadd.f32 %v270_v19, %v94_v17  ;;  %vm584_vm3 = vcmp.eq.s32.totalorder %v579_v7, %v631_v10 }
 0x126   :  { %v286_v22 = vmax.f32 %v276_v18, 0.0 }
 0x127   :  { %v285_v23 = vmax.f32 %v271_v21, 0.0  ;;  %830 = vmatprep.subr.bf16.mxu1 %v829_v20 }
 0x128   :  { %832 = vmatpush3.bf16.msra.mxu1 %v829_v20 }
 0x129   :  { %v833_v24 = vpack.c.bf16 %v286_v22, %v285_v23 }
 0x12b   :  { %834 = vmatprep.subr.bf16.mxu1 %v833_v24 }
 0x12c   :  { %836 = vmatpush3.bf16.msra.mxu1 %v833_v24 }
 0x12f   :  { %743 = vmatmul.mubr.msk.f32.vlgmr.msra.gmra.mrb[0].mxu1 %vm343_vm2, %v288_v25 }
 0x130   :  { %745 = vmatprep.mubr.msk.f32.mxu1 %vm343_vm2, %v289_v26 }
 0x133   :  { %746 = vmatmul.mubr.msk.f32.gmra.mrb[2].mxu1 %vm343_vm2, %v290_v27 }
 0x134   :  { %748 = vmatprep.mubr.msk.f32.mxu1 %vm343_vm2, %v291_v28 }
 0x137   :  { %749 = vmatmul.mubr.msk.f32.gmra.mrb[4].mxu1 %vm343_vm2, %v292_v29 }
 0x138   :  { %751 = vmatprep.mubr.msk.f32.mxu1 %vm343_vm2, %v293_v30 }
 0x13b   :  { %752 = vmatmul.mubr.msk.f32.gmra.mrb[6].mxu1 %vm343_vm2, %v294_v31 }
 0x13c   :  { %770 = vmatprep.mubr.msk.f32.mxu1 %vm343_vm2, %v481_v32 }
 0x202   :  { %v744_v36 = vpop.f32.mrb[0].mxu1 }
 0x203   :  { %v440_v38 = vadd.f32 %v744_v36, %v311_v33  ;;  %v434_v39 = vpop.f32.mrb[1].mxu1 }
 0x204   :  { %v435_v40 = vadd.f32 %v434_v39, %v306_v34 }
 0x205   :  { %v474_v41 = vmax.f32 %v440_v38, 0.0 }
 0x206   :  { %v473_v42 = vmax.f32 %v435_v40, 0.0  ;;  %v747_v43 = vpop.f32.mrb[2].mxu1 }
 0x207   :  { %v450_v44 = vadd.f32 %v747_v43, %v321_v35  ;;  %v444_v45 = vpop.f32.mrb[3].mxu1 }
 0x208   :  { %v837_v47 = vpack.c.bf16 %v474_v41, %v473_v42  ;;  %v445_v48 = vadd.f32 %v444_v45, %v316_v37 }
 0x209   :  { %v476_v50 = vmax.f32 %v450_v44, 0.0 }
 0x20a   :  { %v475_v51 = vmax.f32 %v445_v48, 0.0  ;;  %v750_v52 = vpop.f32.mrb[4].mxu1  ;;  %838 = vmatprep.subr.bf16.mxu1 %v837_v47 }
 0x20b   :  { %v460_v53 = vadd.f32 %v750_v52, %v331_v46  ;;  %v454_v54 = vpop.f32.mrb[5].mxu1  ;;  %840 = vmatpush3.bf16.msra.mxu1 %v837_v47 }
 0x20c   :  { %v841_v55 = vpack.c.bf16 %v476_v50, %v475_v51  ;;  %v455_v56 = vadd.f32 %v454_v54, %v326_v49 }
 0x20d   :  { %v478_v57 = vmax.f32 %v460_v53, 0.0 }
 0x20e   :  { %v477_v59 = vmax.f32 %v455_v56, 0.0  ;;  %v753_v60 = vpop.f32.mrb[6].mxu1  ;;  %842 = vmatprep.subr.bf16.mxu1 %v841_v55 }
 0x20f   :  { %v470_v62 = vadd.f32 %v753_v60, %v341_v58  ;;  %v464_v63 = vpop.f32.mrb[7].mxu1  ;;  %844 = vmatpush3.bf16.msra.mxu1 %v841_v55 }
 0x210   :  { %v845_v0 = vpack.c.bf16 %v478_v57, %v477_v59  ;;  %v465_v1 = vadd.f32 %v464_v63, %v336_v61 }
 0x211   :  { %v480_v2 = vmax.f32 %v470_v62, 0.0 }
 0x212   :  { %v479_v3 = vmax.f32 %v465_v1, 0.0  ;;  %846 = vmatprep.subr.bf16.mxu1 %v845_v0 }
 0x213   :  { %848 = vmatpush3.bf16.msra.mxu1 %v845_v0 }
 0x214   :  { %v849_v4 = vpack.c.bf16 %v480_v2, %v479_v3 }
 0x216   :  { %850 = vmatprep.subr.bf16.mxu1 %v849_v4 }
 0x217   :  { %852 = vmatpush3.bf16.msra.mxu1 %v849_v4 }
 0x21a   :  { %771 = vmatmul.mubr.msk.f32.vlgmr.msra.gmra.mrb[8].mxu1 %vm343_vm2, %v482_v5 }
 0x2ed   :  { %v772_v9 = vpop.f32.mrb[8].mxu1 }
 0x2ee   :  { %v573_v12 = vadd.f32 %v772_v9, %v493_v8  ;;  %v567_v13 = vpop.f32.mrb[9].mxu1 }
 0x2ef   :  { %v568_v14 = vadd.f32 %v567_v13, %v488_v11 }
 0x2f1   :  { %v576_v15 = vmin.f32 %v568_v14, %v573_v12 }
 0x2f3   :  { %v585_v16 = vsel %vm584_vm3, %v576_v15, 0.0 }
 0x2f4   :  { %v586_v17 = vrot.slane %v585_v16, 4 }
 0x2f6   :  { %v587_v18 = vadd.f32 %v586_v17, %v585_v16 }
 0x2f8   :  { %v588_v19 = vrot.slane %v587_v18, 2 }
 0x2fa   :  { %v589_v20 = vadd.f32 %v588_v19, %v587_v18 }
 0x2fc   :  { %v590_v21 = vrot.slane %v589_v20, 1 }
 0x2fe   :  { %v591_v22 = vadd.f32 %v590_v21, %v589_v20 }
 0x300   :  { %592 = vst [vmem:[%s1128_s8] sm:$0x1] %v591_v22 }

</bundles_post_ra>
